<compile_context>
chip_gen: v7x
topology: tpu7x:2x2x1
jax: 0.10.0
libtpu: 0.0.40
codegen_flags: <defaults>
</compile_context>

<pallas_src>
import functools

import jax
import jax.numpy as jnp
from jax.experimental import pallas as pl
from jax.experimental.pallas import tpu as pltpu


_MAX_TILE_N = 8192   # cap on logits-block rows (2 MiB/block at C=128 bf16)
_NUM_CORES = 2       # v7x has 2 TensorCores; extra 'parallel' axis is harmless on 1-TC chips


def _tpu_vmem_capacity_bytes():
    """Per-TensorCore VMEM capacity (generation-aware); conservative fallback."""
    try:
        cap = int(getattr(pltpu.get_tpu_info(), "vmem_capacity_bytes", 0))
        if cap > 0:
            return cap
    except Exception:
        pass
    return 64 << 20  # v7x per-core VMEM (smallest across v5e/v6e/v7x)


def _per_row_vmem_bytes(c, itemsize):
    """Estimated resident VMEM bytes per logits row inside the kernel (incl. padding)."""
    return (2 * c * itemsize   # double-buffered native-dtype logits blocks
            + 2 * c * 4        # f32 promoted-subtract + exp temporaries over the block
            + 2 * 128 * 4      # (T,1) int32 label blocks pad to (T,128) lanes, x2 buffers
            + 4 * 128 * 4)     # a few (T,1) f32 column temps (max/lse/tgt/mask), padded


def _pick_tile_n(n, c, itemsize, budget_bytes, max_tile=_MAX_TILE_N):
    """Largest TILE_N (multiple of 8, <= max_tile) whose total kernel VMEM footprint
    (double-buffered inputs + f32 temporaries + padded label/column blocks) fits the
    generation-aware budget."""
    per_row = _per_row_vmem_bytes(c, itemsize)
    usable = max(budget_bytes - (1 << 20), per_row * 8)   # ~1 MiB headroom
    t = max(8, (usable // per_row) // 8 * 8)
    t = min(t, max_tile)
    return min(t, n)


def _ce_kernel(logits_ref, labels_ref, loss_ref, acc_ref, *,
               total_n, tile_n, steps_per_core):
    # logits_ref: [TILE_N, C] native dtype (bf16 stays packed) in VMEM
    # labels_ref: [TILE_N, 1] int32 in VMEM
    # loss_ref:   [8, 128] f32 VMEM output block (one per 'core' grid index); filled
    #             with this core's partial loss sum on its last inner step.
    # acc_ref:    [1, 1] f32 SMEM scalar accumulator (persists across inner steps)
    core = pl.program_id(0)
    step = pl.program_id(1)
    nsteps = pl.num_programs(1)

    @pl.when(step == 0)
    def _():
        acc_ref[0, 0] = jnp.float32(0.0)

    logits = logits_ref[...]                                      # [T, C] native dtype
    labels = labels_ref[...]                                      # [T, 1] int32
    tn, c = logits.shape

    # Global row offset from the UNCLAMPED grid position (the index_map clamps
    # out-of-range block indices to the last valid block; redundant / past-the-end
    # rows are masked to zero here).
    row0 = (core * steps_per_core + step) * tile_n
    row = jax.lax.broadcasted_iota(jnp.int32, (tn, 1), 0) + row0
    valid = row < total_n                                         # [T, 1] bool

    # Row max and target-logit select on the native dtype (both exact; avoids
    # materializing a full [T, C] f32 copy of the block).
    m = jnp.max(logits, axis=-1, keepdims=True)                   # [T, 1]
    col = jax.lax.broadcasted_iota(jnp.int32, (tn, c), 1)         # [T, C]
    tgt = jnp.sum(jnp.where(col == labels, logits, jnp.zeros_like(logits)),
                  axis=-1, keepdims=True).astype(jnp.float32)     # [T, 1] (exact: 1 nonzero/row)

    # Numerically-stable logsumexp; only the exp/sum path is promoted to f32.
    # NOTE: Pallas OOB-padding garbage of a partial last tile (incl. possible NaNs)
    # is fully masked by the jnp.where(valid, ...) select below.
    m32 = m.astype(jnp.float32)
    s = jnp.sum(jnp.exp(logits.astype(jnp.float32) - m32), axis=-1, keepdims=True)
    lse = m32 + jnp.log(s)                                        # [T, 1]
    # TODO(synk): optional v7x-only bf16 exp (after the f32 max-subtract) if the EUP
    # is still the binding unit post dual-TC split; changes lse by ~1e-3, left off.

    per_sample = jnp.where(valid, lse - tgt, 0.0)                 # [T, 1]

    # Column reduce to a scalar (cross-sublane reduce → XLU, which has slack) and
    # accumulate into the SMEM scalar.
    acc_ref[0, 0] += jnp.sum(per_sample)

    @pl.when(step == nsteps - 1)
    def _():
        # Lane-dense full-block store of this core's partial sum (scalar broadcast).
        loss_ref[...] = jnp.full(loss_ref.shape, acc_ref[0, 0], dtype=jnp.float32)


def cross_entropy_loss(cls_score, label, loss_weight=1.0, tile_n=None):
    """Equivalent of CrossEntropyLoss()(cls_score, label) with default args.

    cls_score: [N, C] float logits (f32 or bf16 — streamed in native dtype)
    label:     [N] integer class indices
    Returns scalar mean cross-entropy * loss_weight (float32).
    """
    n, c = cls_score.shape
    itemsize = jnp.dtype(cls_score.dtype).itemsize

    capacity = _tpu_vmem_capacity_bytes()
    # Total kernel-VMEM budget: ~40 MiB on v7x (64 MiB physical), 64 MiB on v5e/v6e.
    total_budget = min((capacity * 5) // 8, 64 << 20)

    if tile_n is None:
        tile_n = _pick_tile_n(n, c, itemsize, total_budget)
    else:
        tile_n = max(1, min(int(tile_n), n))
        if tile_n < n:
            tile_n = min(-(-tile_n // 8) * 8, n)   # round up to a multiple of 8

    blocks_total = pl.cdiv(n, tile_n)
    num_cores = min(_NUM_CORES, blocks_total)
    steps_per_core = pl.cdiv(blocks_total, num_cores)
    last_block = blocks_total - 1

    labels2d = label.reshape(n, 1).astype(jnp.int32)

    vmem_est = _per_row_vmem_bytes(c, itemsize) * tile_n + (2 << 20)
    vmem_limit = int(min(max(vmem_est, 16 << 20), (capacity * 3) // 4))

    def block_index(ci, si):
        # Clamp: the last core's trailing steps may point past the final block; their
        # rows are masked inside the kernel via the unclamped row offset.
        return (jnp.minimum(ci * steps_per_core + si, last_block), 0)

    kernel = functools.partial(_ce_kernel, total_n=n, tile_n=tile_n,
                               steps_per_core=steps_per_core)

    out = pl.pallas_call(
        kernel,
        out_shape=jax.ShapeDtypeStruct((num_cores * 8, 128), jnp.float32),
        grid=(num_cores, steps_per_core),
        in_specs=[
            pl.BlockSpec((tile_n, c), block_index),
            pl.BlockSpec((tile_n, 1), block_index),
        ],
        out_specs=pl.BlockSpec((8, 128), lambda ci, si: (ci, 0)),
        scratch_shapes=[pltpu.SMEM((1, 1), jnp.float32)],
        compiler_params=pltpu.CompilerParams(
            dimension_semantics=("parallel", "arbitrary"),
            vmem_limit_bytes=vmem_limit,
        ),
    )(cls_score, labels2d)

    partials = out.reshape(num_cores, 8, 128)[:, 0, 0]   # one partial sum per core
    mean_loss = jnp.sum(partials) / jnp.float32(n)

    # TODO(synk): sigmoid / kpos / partial criterions, thrds, per-sample weight,
    # avg_factor, reduction overrides ('none'/'sum') and PyTorch's ignore_index=-100
    # are not wired; this is the default integer-label mean cross-entropy path.
    # TODO(synk): vocab-scale C would need an inner C grid axis with an online
    # (flash-style) logsumexp; here C must fit in a single block.
    return jnp.float32(loss_weight) * mean_loss


if __name__ == "__main__":
    key = jax.random.PRNGKey(0)
    k1, k2, k3, k4, k5, k6 = jax.random.split(key, 6)

    def ref_ce(logits, labels):
        lg = logits.astype(jnp.float32)
        lse = jax.scipy.special.logsumexp(lg, axis=-1)
        tgt = jnp.take_along_axis(lg, labels[:, None], axis=-1)[:, 0]
        return jnp.mean(lse - tgt)

    # Case 1: small f32 batch, single-block path (collapses to one 'core').
    N, C = 8, 128
    logits = jax.random.normal(k1, (N, C), dtype=jnp.float32)
    labels = jax.random.randint(k2, (N,), 0, C, dtype=jnp.int32)
    loss = jax.block_until_ready(cross_entropy_loss(logits, labels))
    ref = ref_ce(logits, labels)
    assert jnp.allclose(loss, ref, rtol=1e-5, atol=1e-5), (loss, ref)

    # Case 2: bf16 logits streamed natively; tiled path with a partial last tile and
    # a clamped redundant block on the second 'core' (grid=(2,2)).
    N2, C2 = 20, 128
    logits2 = jax.random.normal(k3, (N2, C2), dtype=jnp.float32).astype(jnp.bfloat16)
    labels2 = jax.random.randint(k4, (N2,), 0, C2, dtype=jnp.int32)
    loss2 = jax.block_until_ready(cross_entropy_loss(logits2, labels2, tile_n=8))
    ref2 = ref_ce(logits2, labels2)
    assert jnp.allclose(loss2, ref2, rtol=2e-2, atol=2e-2), (loss2, ref2)

    # Case 3: odd block count + partial last tile + non-multiple-of-8 user tile
    # (wrapper rounds it) + loss_weight != 1.
    N3, C3 = 33, 256
    logits3 = jax.random.normal(k5, (N3, C3), dtype=jnp.float32)
    labels3 = jax.random.randint(k6, (N3,), 0, C3, dtype=jnp.int32)
    loss3 = jax.block_until_ready(
        cross_entropy_loss(logits3, labels3, loss_weight=0.5, tile_n=15))
    ref3 = 0.5 * ref_ce(logits3, labels3)
    assert jnp.allclose(loss3, ref3, rtol=1e-5, atol=1e-5), (loss3, ref3)

    print("KERNEL_OK")
</pallas_src>

<mosaic_0001>
module attributes {stable_mosaic.version = 11 : i64} {
  func.func @_ce_kernel(%arg0: i32, %arg1: i32, %arg2: memref<8x128xf32, #tpu.memory_space<vmem>>, %arg3: memref<8x1xi32, #tpu.memory_space<vmem>>, %arg4: memref<8x128xf32, #tpu.memory_space<vmem>>, %arg5: memref<1x1xf32, #tpu.memory_space<smem>>) attributes {dimension_semantics = [#tpu.dimension_semantics<parallel>, #tpu.dimension_semantics<arbitrary>], iteration_bounds = array<i64: 1, 1>, scalar_prefetch = 0 : i64, scratch_operands = 1 : i64, tpu.core_type = #tpu.core_type<tc>, window_params = [{transform_indices = @transform_0, window_bounds = array<i64: 8, 128>}, {transform_indices = @transform_1, window_bounds = array<i64: 8, 1>}, {transform_indices = @transform_2, window_bounds = array<i64: 8, 128>}]} {
    %c0_i32 = arith.constant 0 : i32
    %0 = arith.cmpi eq, %arg1, %c0_i32 : i32
    %1 = arith.extui %0 : i1 to i32
    %c0_i32_0 = arith.constant 0 : i32
    %2 = arith.cmpi ne, %1, %c0_i32_0 : i32
    scf.if %2 {
      %cst_16 = arith.constant 0.000000e+00 : f32
      %c0_17 = arith.constant 0 : index
      %c0_18 = arith.constant 0 : index
      %42 = memref.load %arg5[%c0_17, %c0_18] : memref<1x1xf32, #tpu.memory_space<smem>>
      memref.store %cst_16, %arg5[%c0_17, %c0_18] : memref<1x1xf32, #tpu.memory_space<smem>>
    } else {
    }
    %c0 = arith.constant 0 : index
    %c0_1 = arith.constant 0 : index
    %3 = vector.load %arg2[%c0, %c0_1] : memref<8x128xf32, #tpu.memory_space<vmem>>, vector<8x128xf32>
    %c0_2 = arith.constant 0 : index
    %c0_3 = arith.constant 0 : index
    %4 = vector.load %arg3[%c0_2, %c0_3] : memref<8x1xi32, #tpu.memory_space<vmem>>, vector<8x1xi32>
    %c1_i32 = arith.constant 1 : i32
    %5 = arith.muli %arg0, %c1_i32 : i32
    %6 = arith.addi %5, %arg1 : i32
    %c8_i32 = arith.constant 8 : i32
    %7 = arith.muli %6, %c8_i32 : i32
    %8 = tpu.iota {dimensions = array<i32: 0>} : vector<8x1xi32>
    %9 = vector.broadcast %7 : i32 to vector<8x1xi32>
    %10 = arith.addi %8, %9 : vector<8x1xi32>
    %c8_i32_4 = arith.constant 8 : i32
    %11 = vector.broadcast %c8_i32_4 : i32 to vector<8x1xi32>
    %12 = arith.cmpi slt, %10, %11 : vector<8x1xi32>
    %cst = arith.constant dense<0xFF800000> : vector<8xf32>
    %13 = vector.multi_reduction <maximumf>, %3, %cst [1] : vector<8x128xf32> to vector<8xf32>
    %14 = vector.shape_cast %13 : vector<8xf32> to vector<8x1xf32>
    %15 = tpu.iota {dimensions = array<i32: 1>} : vector<8x128xi32>
    %16 = vector.broadcast %4 : vector<8x1xi32> to vector<8x128xi32>
    %17 = arith.cmpi eq, %15, %16 : vector<8x128xi32>
    %cst_5 = arith.constant 0.000000e+00 : f32
    %18 = vector.broadcast %cst_5 : f32 to vector<8x128xf32>
    %19 = arith.select %17, %3, %18 : vector<8x128xi1>, vector<8x128xf32>
    %cst_6 = arith.constant dense<0.000000e+00> : vector<8xf32>
    %20 = vector.multi_reduction <add>, %19, %cst_6 [1] : vector<8x128xf32> to vector<8xf32>
    %21 = vector.shape_cast %20 : vector<8xf32> to vector<8x1xf32>
    %22 = vector.broadcast %14 : vector<8x1xf32> to vector<8x128xf32>
    %23 = arith.subf %3, %22 : vector<8x128xf32>
    %24 = math.exp %23 : vector<8x128xf32>
    %cst_7 = arith.constant dense<0.000000e+00> : vector<8xf32>
    %25 = vector.multi_reduction <add>, %24, %cst_7 [1] : vector<8x128xf32> to vector<8xf32>
    %26 = vector.shape_cast %25 : vector<8xf32> to vector<8x1xf32>
    %27 = math.log %26 : vector<8x1xf32>
    %28 = arith.addf %14, %27 : vector<8x1xf32>
    %29 = arith.subf %28, %21 : vector<8x1xf32>
    %cst_8 = arith.constant 0.000000e+00 : f32
    %30 = vector.broadcast %cst_8 : f32 to vector<8x1xf32>
    %31 = arith.select %12, %29, %30 : vector<8x1xi1>, vector<8x1xf32>
    %c0_9 = arith.constant 0 : index
    %c0_10 = arith.constant 0 : index
    %32 = memref.load %arg5[%c0_9, %c0_10] : memref<1x1xf32, #tpu.memory_space<smem>>
    %33 = vector.shape_cast %31 : vector<8x1xf32> to vector<1x8x1xf32>
    %cst_11 = arith.constant dense<0.000000e+00> : vector<1xf32>
    %34 = vector.multi_reduction <add>, %33, %cst_11 [1, 2] : vector<1x8x1xf32> to vector<1xf32>
    %35 = vector.shape_cast %34 : vector<1xf32> to vector<1x1x1xf32>
    %36 = vector.extract %35[0, 0, 0] : f32 from vector<1x1x1xf32>
    %37 = arith.addf %32, %36 : f32
    %c0_12 = arith.constant 0 : index
    %c0_13 = arith.constant 0 : index
    %38 = memref.load %arg5[%c0_12, %c0_13] : memref<1x1xf32, #tpu.memory_space<smem>>
    memref.store %37, %arg5[%c0_12, %c0_13] : memref<1x1xf32, #tpu.memory_space<smem>>
    %c0_i32_14 = arith.constant 0 : i32
    %39 = arith.cmpi eq, %arg1, %c0_i32_14 : i32
    %40 = arith.extui %39 : i1 to i32
    %c0_i32_15 = arith.constant 0 : i32
    %41 = arith.cmpi ne, %40, %c0_i32_15 : i32
    scf.if %41 {
      %c0_16 = arith.constant 0 : index
      %c0_17 = arith.constant 0 : index
      %42 = memref.load %arg5[%c0_16, %c0_17] : memref<1x1xf32, #tpu.memory_space<smem>>
      %43 = vector.broadcast %42 : f32 to vector<8x128xf32>
      %c0_18 = arith.constant 0 : index
      %c0_19 = arith.constant 0 : index
      %44 = vector.load %arg4[%c0_18, %c0_19] : memref<8x128xf32, #tpu.memory_space<vmem>>, vector<8x128xf32>
      tpu.vector_store %arg4[%c0_18, %c0_19], %43 {strides = array<i32>} : memref<8x128xf32, #tpu.memory_space<vmem>>, vector<8x128xf32>,
    } else {
    }
    return
  }
  func.func @transform_0(%arg0: i32, %arg1: i32) -> (i32, i32) {
    %c1_i32 = arith.constant 1 : i32
    %0 = arith.muli %arg0, %c1_i32 : i32
    %1 = arith.addi %0, %arg1 : i32
    %c0_i32 = arith.constant 0 : i32
    %2 = arith.minsi %1, %c0_i32 : i32
    %c0_i32_0 = arith.constant 0 : i32
    %c0_i32_1 = arith.constant 0 : i32
    return %2, %c0_i32_0 : i32, i32
  }
  func.func @transform_1(%arg0: i32, %arg1: i32) -> (i32, i32) {
    %c1_i32 = arith.constant 1 : i32
    %0 = arith.muli %arg0, %c1_i32 : i32
    %1 = arith.addi %0, %arg1 : i32
    %c0_i32 = arith.constant 0 : i32
    %2 = arith.minsi %1, %c0_i32 : i32
    %c0_i32_0 = arith.constant 0 : i32
    %c0_i32_1 = arith.constant 0 : i32
    return %2, %c0_i32_0 : i32, i32
  }
  func.func @transform_2(%arg0: i32, %arg1: i32) -> (i32, i32) {
    %c0_i32 = arith.constant 0 : i32
    %c0_i32_0 = arith.constant 0 : i32
    return %arg0, %c0_i32 : i32, i32
  }
}

</mosaic_0001>

<bundles_post_ra>
// kernel: tpu_custom_call.1
= control target key start
LH: loop header
LB: loop body
LE: loop exit
PB: predicated region body
PF: predicated region fallthrough
CT: control target
= control target key end

     0   :  { %s217_s0 = inlined_call_operand.vmem [shape: f32[8,128], index: 0, kind: input, shape index: {}]   ;;  %s218_s1 = inlined_call_operand.vmem [shape: s32[8,1], index: 1, kind: input, shape index: {}]   ;;  %s219_s2 = inlined_call_operand.hbm [shape: f32[8,128], index: 2, kind: output, shape index: {}]  }
   0x1   :  { %v72_v0 = vld [vmem:[%s217_s0] sm:$0xff] }
   0x2   :  { %7 = vsyncpa [#allocation4], 0  ;;  %81 = vmax.xlane.f32.xlu0 %v72_v0  ;;  %v182_v1 = vmov 0   ;;  %v73_v2 = vld [vmem:[%s218_s1] sm:$0xff]  ;;  %v83_v6 = vlaneseq  ;;  %vm103_vm1 = vcmask 7168   ;;  %s183_s0 = smov [#allocation3]  }
   0x3   :  { %153 = vset.pattern.permute.xlu0 %v182_v1  ;;  %s129_s1 = sshll.u32 %s183_s0, 4  ;;  %s130_s1 = int_to_ptr.vmem [resolvable:$true] %s129_s1 }
   0x4   :  { %v84_v7 = vand.u32 127, %v83_v6  ;;  %s158_s14 = scalar_lea.vmem %s130_s1, 128  ;;  %p163_p1 = scmp.lt.s32.totalorder %s130_s1, %s130_s1 }
   0x5   :  { %p159_p0 = scmp.ne.s32.totalorder %s130_s1, %s158_s14  ;;  %p164_p2 = scmp.lt.s32.totalorder %s158_s14, %s158_s14 }
   0x7   :  { %p165_p3 = por %p164_p2, %p163_p1 }
   0x9   :  { %p166_p4 = pnand %p165_p3, %p159_p0 }
  0x18   :  { %86 = vperm.xlu0 %153, %v73_v2  }
  0x8f   :  { %v82_v3 = vpop.xlane.xlu0 %81 }
  0x90   :  { %v92_v4 = vsub.f32 %v72_v0, %v82_v3 }
  0x92   :  { %v93_v5 = vmul.f32 1.442695, %v92_v4 }
  0x94   :  { %154 = vpow2.f32 %v93_v5 }
  0x97   :  { %v87_v8 = vpop.permute.xlu0 %86 }
  0x98   :  { %vm88_vm0 = vcmp.eq.s32.totalorder %v84_v7, %v87_v8 }
  0x99   :  { %v89_v10 = vsel %vm88_vm0, %v72_v0, 0.0 }
  0x9e   :  { %v155_v9 = vpop.eup %154 }
  0x9f   :  { %95 = vadd.xlane.f32.xlu1 %v155_v9 }
  0xa3   :  { %90 = vadd.xlane.f32.xlu1 %v89_v10 }
 0x12c   :  { %v96_v11 = vpop.xlane.xlu1 %95 }
 0x12d   :  { %156 = vlog2.f32 %v96_v11 }
 0x130   :  { %v91_v14 = vpop.xlane.xlu1 %90 }
 0x137   :  { %v157_v12 = vpop.eup %156 }
 0x138   :  { %v98_v13 = vmul.f32 0.6931472, %v157_v12 }
 0x13a   :  { %v99_v15 = vadd.f32 %v98_v13, %v82_v3 }
 0x13c   :  { %v100_v16 = vsub.f32 %v99_v15, %v91_v14 }
 0x13e   :  { %v104_v17 = vsel %vm103_vm1, %v100_v16, 0.0 }
 0x13f   :  { %105 = vadd.xlane.f32.xlu1 %v104_v17 }
 0x1cc   :  { %v106_v18 = vpop.xlane.xlu1 %105 }
 0x1cd   :  { %v107_v19 = vrot.slane %v106_v18, 4 }
 0x1cf   :  { %v108_v20 = vadd.f32 %v107_v19, %v106_v18 }
 0x1d1   :  { %v109_v21 = vrot.slane %v108_v20, 2 }
 0x1d3   :  { %v110_v22 = vadd.f32 %v109_v21, %v108_v20 }
 0x1d5   :  { %v111_v23 = vrot.slane %v110_v22, 1 }
 0x1d7   :  { %v112_v24 = vadd.f32 %v111_v23, %v110_v22 }
 0x1d9   :  { %149 = vpush %v112_v24 }
 0x20a   :  { %s150_s13 = spop %149 }
 0x20b   :  { %v121_v25 = vstv %s150_s13 }
 0x20c   :  { %122 = vst [vmem:[#allocation3] sm:$0xff] %v121_v25 }
 0x20d   :  { %169 = shalt.err (!%p166_p4)
}
 0x20e   :  { %s170_s17 = scalar_lea.hbm %s219_s2, 128 }
 0x20f   :  { %p171_p5 = scmp.ne.s32.totalorder %s219_s2, %s170_s17  ;;  %p174_p6 = scmp.lt.u32.totalorder %s170_s17, %s219_s2 }
 0x211   :  { %p176_p7 = pnand %p174_p6, %p171_p5 }
 0x213   :  { %179 = shalt.err (!%p176_p7)
}
 0x214   :  { %132 = dma.vmem_to_hbm [thread:$0]  %s130_s1, 128, %s219_s2, [#allocation4]  }
 0x215   :  { %180 = dma.done.wait [#allocation4], 128  }
 0x216   :  { %181 = vsyncadd [#allocation4], 4294967168 }
 0x217   :  { %136 = vsyncpa [#allocation4], 1 }

</bundles_post_ra>
